<compile_context>
chip_gen: v6e
topology: v6e:2x2x1
jax: 0.10.0
libtpu: 0.0.40
codegen_flags: <defaults>
</compile_context>

<pallas_src>
import jax
import jax.numpy as jnp
from jax.experimental import pallas as pl
from jax.experimental.pallas import tpu as pltpu


# ----------------------------------------------------------------------------
# Kernel: gather (as one MXU matmul against a precomputed 0/1 matrix) + noise
#         + ReLU-style clamp, fused.
# ----------------------------------------------------------------------------
def _observe_kernel(std_ref, x_ref, onehot_ref, noise_ref, o_ref):
    # std_ref    : SMEM (1,)       f32  -- noise_std (runtime scalar)
    # x_ref      : VMEM (TB, Np)   f32  -- batch tile of white_box_output
    # onehot_ref : VMEM (Np, Mp)   f32  -- precomputed gather matrix (static)
    # noise_ref  : VMEM (TB, Mp)   f32  -- standard-normal noise tile
    # o_ref      : VMEM (TB, Mp)   f32
    obs = jnp.dot(x_ref[...], onehot_ref[...],
                  preferred_element_type=jnp.float32)          # (TB, Mp) MXU
    o_ref[...] = jnp.maximum(obs + std_ref[0] * noise_ref[...], 0.0)


# ----------------------------------------------------------------------------
# Wrapper
# ----------------------------------------------------------------------------
def _round_up(x, m):
    return (x + m - 1) // m * m


def make_gather_onehot(obs_idx, n_points):
    """Precompute the (N, M) 0/1 gather matrix once per model.

    obs_idx is static, so this runs once (outside the hot path); multipliers
    are exactly 0/1 so the gather-by-matmul is exact in f32.
    """
    M = obs_idx.shape[0]
    col = jnp.arange(n_points, dtype=jnp.int32)[:, None]          # (N, 1)
    return (col == obs_idx[None, :].astype(jnp.int32)).astype(jnp.float32)


def observe(white_box_output, onehot, noise_std, key, *, batch_tile=256):
    """white_box_output: (B, N) f32, onehot: (N, M) f32 -> (B, M) f32."""
    B, N = white_box_output.shape
    Nh, M = onehot.shape
    assert Nh == N

    # Pad to legal / lane-dense tile shapes: last dims -> multiples of 128,
    # batch -> multiple of the (f32-sublane-aligned) batch tile.
    Np = _round_up(N, 128)
    Mp = _round_up(M, 128)
    TB = min(batch_tile, _round_up(B, 8))
    Bp = _round_up(B, TB)

    x = jnp.zeros((Bp, Np), jnp.float32)
    x = x.at[:B, :N].set(white_box_output.astype(jnp.float32))
    oh = jnp.zeros((Np, Mp), jnp.float32)
    oh = oh.at[:N, :M].set(onehot.astype(jnp.float32))
    noise = jax.random.normal(key, (Bp, Mp), dtype=jnp.float32)
    std = jnp.asarray([noise_std], dtype=jnp.float32)

    grid = (Bp // TB,)
    out = pl.pallas_call(
        _observe_kernel,
        out_shape=jax.ShapeDtypeStruct((Bp, Mp), jnp.float32),
        grid=grid,
        in_specs=[
            pl.BlockSpec(memory_space=pltpu.SMEM),        # noise_std scalar
            pl.BlockSpec((TB, Np), lambda i: (i, 0)),     # x batch tile
            pl.BlockSpec((Np, Mp), lambda i: (0, 0)),     # onehot (fixed block)
            pl.BlockSpec((TB, Mp), lambda i: (i, 0)),     # noise tile
        ],
        out_specs=pl.BlockSpec((TB, Mp), lambda i: (i, 0)),
        compiler_params=pltpu.CompilerParams(
            dimension_semantics=("parallel",),
            vmem_limit_bytes=64 << 20,
        ),
    )(std, x, oh, noise)
    return out[:B, :M]


def make_obs_idx(coordinates, nx, ny):
    """Deterministic surrogate for utils.observability_idx: nearest point to
    each of the nx*ny grid-cell centers over the coordinate bounding box."""
    min_xy = jnp.min(coordinates, axis=0)
    max_xy = jnp.max(coordinates, axis=0)
    gx = min_xy[0] + (jnp.arange(nx, dtype=jnp.float32) + 0.5) / nx * (max_xy[0] - min_xy[0])
    gy = min_xy[1] + (jnp.arange(ny, dtype=jnp.float32) + 0.5) / ny * (max_xy[1] - min_xy[1])
    cx, cy = jnp.meshgrid(gx, gy, indexing="ij")
    centers = jnp.stack([cx.ravel(), cy.ravel()], axis=-1)          # (nx*ny, 2)
    d2 = jnp.sum((centers[:, None, :] - coordinates[None, :, :]) ** 2, axis=-1)
    return jnp.argmin(d2, axis=-1).astype(jnp.int32)                # (nx*ny,)


if __name__ == "__main__":
    key = jax.random.PRNGKey(0)
    k_coord, k_x, k_noise = jax.random.split(key, 3)

    B = 2            # batch
    N = 256          # number of coordinate points (columns of white_box_output)
    nx, ny = 16, 8   # observation grid -> M = 128 observed locations
    noise_std = 0.01

    coordinates = jax.random.uniform(k_coord, (N, 2), dtype=jnp.float32)
    obs_idx = make_obs_idx(coordinates, nx, ny)
    onehot = make_gather_onehot(obs_idx, N)          # precomputed once (static)

    white_box_output = jax.random.uniform(k_x, (B, N), dtype=jnp.float32)

    # 1) Noiseless run: exact check of the fused gather + clamp path.
    out0 = observe(white_box_output, onehot, 0.0, k_noise)
    jax.block_until_ready(out0)
    ref0 = jnp.maximum(white_box_output[:, obs_idx], 0.0)
    assert out0.shape == (B, nx * ny)
    assert jnp.allclose(out0, ref0, atol=1e-6, rtol=1e-6)

    # 2) Noisy run (same compiled kernel -- noise_std is a runtime SMEM scalar).
    out = observe(white_box_output, onehot, noise_std, k_noise)
    jax.block_until_ready(out)

    assert out.shape == (B, nx * ny)
    assert out.dtype == jnp.float32
    assert bool(jnp.all(out >= 0.0))
    assert bool(jnp.max(jnp.abs(out - ref0)) < 10.0 * noise_std)
    print("KERNEL_OK")
</pallas_src>

<mosaic_0001>
module attributes {stable_mosaic.version = 11 : i64} {
  func.func @_observe_kernel(%arg0: i32, %arg1: memref<1xf32, #tpu.memory_space<smem>>, %arg2: memref<8x256xf32, #tpu.memory_space<vmem>>, %arg3: memref<256x128xf32, #tpu.memory_space<vmem>>, %arg4: memref<8x128xf32, #tpu.memory_space<vmem>>, %arg5: memref<8x128xf32, #tpu.memory_space<vmem>>) attributes {dimension_semantics = [#tpu.dimension_semantics<parallel>], iteration_bounds = array<i64: 1>, scalar_prefetch = 0 : i64, scratch_operands = 0 : i64, tpu.core_type = #tpu.core_type<tc>, window_params = [{transform_indices = @transform_0, window_bounds = array<i64: 1>}, {transform_indices = @transform_1, window_bounds = array<i64: 8, 256>}, {pipeline_mode = #tpu.pipeline_mode<synchronous>, transform_indices = @transform_2, window_bounds = array<i64: 256, 128>}, {transform_indices = @transform_3, window_bounds = array<i64: 8, 128>}, {transform_indices = @transform_4, window_bounds = array<i64: 8, 128>}]} {
    %c0 = arith.constant 0 : index
    %c0_0 = arith.constant 0 : index
    %0 = vector.load %arg2[%c0, %c0_0] : memref<8x256xf32, #tpu.memory_space<vmem>>, vector<8x256xf32>
    %c0_1 = arith.constant 0 : index
    %c0_2 = arith.constant 0 : index
    %1 = vector.load %arg3[%c0_1, %c0_2] : memref<256x128xf32, #tpu.memory_space<vmem>>, vector<256x128xf32>
    %cst = arith.constant dense<0.000000e+00> : vector<8x128xf32>
    %2 = tpu.matmul %0, %1, %cst {dimension_numbers = #tpu.dot_dimension_numbers<[1], [0], [0], [1], [0, 0, 1, 1], [], []>} : vector<8x256xf32>, vector<256x128xf32>, vector<8x128xf32> -> vector<8x128xf32>
    %c0_3 = arith.constant 0 : index
    %3 = memref.load %arg1[%c0_3] : memref<1xf32, #tpu.memory_space<smem>>
    %c0_4 = arith.constant 0 : index
    %c0_5 = arith.constant 0 : index
    %4 = vector.load %arg4[%c0_4, %c0_5] : memref<8x128xf32, #tpu.memory_space<vmem>>, vector<8x128xf32>
    %5 = vector.broadcast %3 : f32 to vector<8x128xf32>
    %6 = arith.mulf %5, %4 : vector<8x128xf32>
    %7 = arith.addf %2, %6 : vector<8x128xf32>
    %cst_6 = arith.constant 0.000000e+00 : f32
    %8 = vector.broadcast %cst_6 : f32 to vector<8x128xf32>
    %9 = arith.maximumf %7, %8 : vector<8x128xf32>
    %c0_7 = arith.constant 0 : index
    %c0_8 = arith.constant 0 : index
    %10 = vector.load %arg5[%c0_7, %c0_8] : memref<8x128xf32, #tpu.memory_space<vmem>>, vector<8x128xf32>
    tpu.vector_store %arg5[%c0_7, %c0_8], %9 {strides = array<i32>} : memref<8x128xf32, #tpu.memory_space<vmem>>, vector<8x128xf32>,
    return
  }
  func.func @transform_0(%arg0: i32) -> i32 {
    %c0_i32 = arith.constant 0 : i32
    %c0_i32_0 = arith.constant 0 : i32
    return %c0_i32 : i32
  }
  func.func @transform_1(%arg0: i32) -> (i32, i32) {
    %c0_i32 = arith.constant 0 : i32
    %c0_i32_0 = arith.constant 0 : i32
    return %arg0, %c0_i32 : i32, i32
  }
  func.func @transform_2(%arg0: i32) -> (i32, i32) {
    %c0_i32 = arith.constant 0 : i32
    %c0_i32_0 = arith.constant 0 : i32
    %c0_i32_1 = arith.constant 0 : i32
    return %c0_i32, %c0_i32_0 : i32, i32
  }
  func.func @transform_3(%arg0: i32) -> (i32, i32) {
    %c0_i32 = arith.constant 0 : i32
    %c0_i32_0 = arith.constant 0 : i32
    return %arg0, %c0_i32 : i32, i32
  }
  func.func @transform_4(%arg0: i32) -> (i32, i32) {
    %c0_i32 = arith.constant 0 : i32
    %c0_i32_0 = arith.constant 0 : i32
    return %arg0, %c0_i32 : i32, i32
  }
}

</mosaic_0001>

<bundles_post_ra>
// kernel: tpu_custom_call.1
= control target key start
LH: loop header
LB: loop body
LE: loop exit
PB: predicated region body
PF: predicated region fallthrough
CT: control target
= control target key end

     0   :  { %10 = vsyncpa [#allocation4], 0  ;;  %s355_s0 = inlined_call_operand.<no memory space> [shape: f32[1], index: 0, kind: input, shape index: {}]   ;;  %s356_s1 = inlined_call_operand.hbm [shape: f32[8,256], index: 1, kind: input, shape index: {}]   ;;  %s357_s2 = inlined_call_operand.hbm [shape: f32[256,128], index: 2, kind: input, shape index: {}]   ;;  %s358_s3 = inlined_call_operand.hbm [shape: f32[8,128], index: 3, kind: input, shape index: {}]   ;;  %s359_s4 = inlined_call_operand.hbm [shape: f32[8,128], index: 4, kind: output, shape index: {}]  }
   0x1   :  { %11 = vsyncpa [#allocation7], 0 }
   0x2   :  { %12 = vsyncpa [#allocation5], 0  ;;  %s309_s15 = smov [#allocation6]  }
   0x3   :  { %s30_s16 = sshll.u32 %s309_s15, 4  ;;  %s31_s16 = int_to_ptr.vmem [resolvable:$true] %s30_s16 }
   0x4   :  { %s231_s17 = scalar_lea.vmem %s31_s16, 4096  ;;  %p236_p1 = scmp.lt.s32.totalorder %s31_s16, %s31_s16 }
   0x5   :  { %p232_p0 = scmp.ne.s32.totalorder %s31_s16, %s231_s17  ;;  %p237_p2 = scmp.lt.s32.totalorder %s231_s17, %s231_s17 }
   0x7   :  { %p238_p3 = por %p237_p2, %p236_p1 }
   0x9   :  { %p239_p4 = pnand %p238_p3, %p232_p0 }
   0xb   :  { %242 = shalt.err (!%p239_p4)
}
   0xc   :  { %s310_s18 = smov 128   ;;  %s311_s19 = smov 8  }
   0xd   :  { %36 = dma.hbm_to_vmem [thread:$0]  %s357_s2, 4096, %s31_s16, [#allocation7], %s310_s18, %s310_s18, %s311_s19  }
   0xe   :  { %s312_s22 = smov [#allocation3]   ;;  %s313_s24 = smov [#allocation8]  }
   0xf   :  { %s21_s23 = sshll.u32 %s312_s22, 4  ;;  %s43_s25 = sshll.u32 %s313_s24, 4  ;;  %s22_s23 = int_to_ptr.vmem [resolvable:$true] %s21_s23  ;;  %s44_s25 = int_to_ptr.vmem [resolvable:$true] %s43_s25 }
  0x10   :  { %s251_s26 = scalar_lea.vmem %s22_s23, 256  ;;  %p256_p6 = scmp.lt.s32.totalorder %s22_s23, %s22_s23 }
  0x11   :  { %p252_p5 = scmp.ne.s32.totalorder %s22_s23, %s251_s26  ;;  %p257_p7 = scmp.lt.s32.totalorder %s251_s26, %s251_s26 }
  0x13   :  { %p258_p8 = por %p257_p7, %p256_p6 }
  0x15   :  { %p259_p9 = pnand %p258_p8, %p252_p5 }
  0x17   :  { %262 = shalt.err (!%p259_p9)
}
  0x18   :  { %24 = dma.hbm_to_vmem [thread:$0]  %s356_s1, 256, %s22_s23, [#allocation4]  }
  0x19   :  { %s271_s29 = scalar_lea.vmem %s44_s25, 128  ;;  %p276_p11 = scmp.lt.s32.totalorder %s44_s25, %s44_s25 }
  0x1a   :  { %p272_p10 = scmp.ne.s32.totalorder %s44_s25, %s271_s29  ;;  %p277_p12 = scmp.lt.s32.totalorder %s271_s29, %s271_s29 }
  0x1c   :  { %p278_p13 = por %p277_p12, %p276_p11 }
  0x1e   :  { %p279_p0 = pnand %p278_p13, %p272_p10 }
  0x20   :  { %282 = shalt.err (!%p279_p0)
}
  0x21   :  { %46 = dma.hbm_to_vmem [thread:$0]  %s358_s3, 128, %s44_s25, [#allocation7]  }
  0x22   :  { %303 = dma.done.wait [#allocation4], 256  }
  0x23   :  { %304 = vsyncadd [#allocation4], 4294967040 }
  0x24   :  { %305 = dma.done.wait [#allocation7], 4224  }
  0x25   :  { %306 = vsyncadd [#allocation7], 4294963072  ;;  %v89_v0 = vld [vmem:[#allocation6 + $0xf8] sm:$0xff]  ;;  %v88_v2 = vld [vmem:[#allocation6 + $0xf0] sm:$0xff]  ;;  %v92_v35 = vstv %s355_s0  ;;  %s314_s5 = smov [#allocation9]  }
  0x26   :  { %v73_v1 = vld [vmem:[#allocation6 + $0x78] sm:$0xff]  ;;  %182 = vmatprep.subr.mxu0 %v89_v0  ;;  %v72_v3 = vld [vmem:[#allocation6 + $0x70] sm:$0xff]  ;;  %v87_v4 = vld [vmem:[#allocation6 + $0xe8] sm:$0xff]  ;;  %s172_s6 = sshll.u32 %s314_s5, 4  ;;  %s173_s6 = int_to_ptr.vmem [resolvable:$true] %s172_s6 }
  0x27   :  { %183 = vmatpush3.msra.mxu0 %v73_v1  ;;  %v71_v5 = vld [vmem:[#allocation6 + $0x68] sm:$0xff]  ;;  %v86_v6 = vld [vmem:[#allocation6 + $0xe0] sm:$0xff]  ;;  %v85_v8 = vld [vmem:[#allocation6 + $0xd8] sm:$0xff]  ;;  %s283_s7 = scalar_lea.vmem %s173_s6, 128  ;;  %p288_p2 = scmp.lt.s32.totalorder %s173_s6, %s173_s6 }
  0x28   :  { %184 = vmatprep.subr.mxu0 %v88_v2  ;;  %v70_v7 = vld [vmem:[#allocation6 + $0x60] sm:$0xff]  ;;  %v69_v9 = vld [vmem:[#allocation6 + $0x58] sm:$0xff]  ;;  %v84_v10 = vld [vmem:[#allocation6 + $0xd0] sm:$0xff]  ;;  %p284_p1 = scmp.ne.s32.totalorder %s173_s6, %s283_s7  ;;  %p289_p3 = scmp.lt.s32.totalorder %s283_s7, %s283_s7 }
  0x29   :  { %185 = vmatpush3.msra.mxu0 %v72_v3  ;;  %v68_v11 = vld [vmem:[#allocation6 + $0x50] sm:$0xff]  ;;  %v83_v12 = vld [vmem:[#allocation6 + $0xc8] sm:$0xff]  ;;  %v57_v13 = vld [vmem:[#allocation3 + $0x8] sm:$0xff] }
  0x2a   :  { %186 = vmatprep.subr.mxu0 %v87_v4  ;;  %v67_v14 = vld [vmem:[#allocation6 + $0x48] sm:$0xff]  ;;  %158 = vmatprep.mubr.f32.mxu0 %v57_v13  ;;  %v82_v15 = vld [vmem:[#allocation6 + $0xc0] sm:$0xff]  ;;  %v81_v17 = vld [vmem:[#allocation6 + $0xb8] sm:$0xff]  ;;  %p290_p4 = por %p289_p3, %p288_p2 }
  0x2b   :  { %187 = vmatpush3.msra.mxu0 %v71_v5  ;;  %v66_v16 = vld [vmem:[#allocation6 + $0x40] sm:$0xff]  ;;  %v65_v18 = vld [vmem:[#allocation6 + $0x38] sm:$0xff]  ;;  %v80_v19 = vld [vmem:[#allocation6 + $0xb0] sm:$0xff] }
  0x2c   :  { %188 = vmatprep.subr.mxu0 %v86_v6  ;;  %v64_v20 = vld [vmem:[#allocation6 + $0x30] sm:$0xff]  ;;  %v79_v21 = vld [vmem:[#allocation6 + $0xa8] sm:$0xff]  ;;  %v78_v23 = vld [vmem:[#allocation6 + $0xa0] sm:$0xff]  ;;  %p291_p5 = pnand %p290_p4, %p284_p1 }
  0x2d   :  { %189 = vmatpush3.msra.mxu0 %v70_v7  ;;  %v63_v22 = vld [vmem:[#allocation6 + $0x28] sm:$0xff]  ;;  %v62_v24 = vld [vmem:[#allocation6 + $0x20] sm:$0xff]  ;;  %v77_v25 = vld [vmem:[#allocation6 + $0x98] sm:$0xff] }
  0x2e   :  { %190 = vmatprep.subr.mxu0 %v85_v8  ;;  %v61_v26 = vld [vmem:[#allocation6 + $0x18] sm:$0xff]  ;;  %v76_v27 = vld [vmem:[#allocation6 + $0x90] sm:$0xff]  ;;  %v75_v29 = vld [vmem:[#allocation6 + $0x88] sm:$0xff] }
  0x2f   :  { %191 = vmatpush3.msra.mxu0 %v69_v9  ;;  %v60_v28 = vld [vmem:[#allocation6 + $0x10] sm:$0xff]  ;;  %v59_v30 = vld [vmem:[#allocation6 + $0x8] sm:$0xff]  ;;  %v74_v31 = vld [vmem:[#allocation6 + $0x80] sm:$0xff] }
  0x30   :  { %192 = vmatprep.subr.mxu0 %v84_v10  ;;  %v58_v32 = vld [vmem:[#allocation6] sm:$0xff]  ;;  %v56_v33 = vld [vmem:[#allocation3] sm:$0xff] }
  0x31   :  { %193 = vmatpush3.msra.mxu0 %v68_v11  ;;  %v91_v34 = vld [vmem:[#allocation8] sm:$0xff] }
  0x32   :  { %194 = vmatprep.subr.mxu0 %v83_v12  ;;  %v93_v37 = vmul.f32 %v92_v35, %v91_v34 }
  0x33   :  { %195 = vmatpush3.msra.mxu0 %v67_v14 }
  0x34   :  { %196 = vmatprep.subr.mxu0 %v82_v15 }
  0x35   :  { %197 = vmatpush3.msra.mxu0 %v66_v16 }
  0x36   :  { %198 = vmatprep.subr.mxu0 %v81_v17 }
  0x37   :  { %199 = vmatpush3.msra.mxu0 %v65_v18 }
  0x38   :  { %200 = vmatprep.subr.mxu0 %v80_v19 }
  0x39   :  { %201 = vmatpush3.msra.mxu0 %v64_v20 }
  0x3a   :  { %202 = vmatprep.subr.mxu0 %v79_v21 }
  0x3b   :  { %203 = vmatpush3.msra.mxu0 %v63_v22 }
  0x3c   :  { %204 = vmatprep.subr.mxu0 %v78_v23 }
  0x3d   :  { %205 = vmatpush3.msra.mxu0 %v62_v24 }
  0x3e   :  { %206 = vmatprep.subr.mxu0 %v77_v25 }
  0x3f   :  { %207 = vmatpush3.msra.mxu0 %v61_v26 }
  0x40   :  { %208 = vmatprep.subr.mxu0 %v76_v27 }
  0x41   :  { %209 = vmatpush3.msra.mxu0 %v60_v28 }
  0x42   :  { %210 = vmatprep.subr.mxu0 %v75_v29 }
  0x43   :  { %211 = vmatpush3.msra.mxu0 %v59_v30 }
  0x44   :  { %212 = vmatprep.subr.mxu0 %v74_v31 }
  0x45   :  { %213 = vmatpush3.msra.mxu0 %v58_v32 }
  0x46   :  { %159 = vmatmul.mubr.f32.vlgmr.msra.gmra.mxu0 %v56_v33 }
 0x106   :  { %v214_v36 = vpop.f32.mrf.mxu0 }
 0x108   :  { %v215_v38 = vpop.f32.mrf.mxu0 }
 0x109   :  { %v216_v39 = vadd.f32 %v215_v38, %v214_v36 }
 0x10b   :  { %v161_v40 = vadd.f32 %v216_v39, %v93_v37 }
 0x10d   :  { %v164_v41 = vmax.f32 %v161_v40, 0.0 }
 0x10f   :  { %165 = vst [vmem:[#allocation9] sm:$0xff] %v164_v41 }
 0x110   :  { %294 = shalt.err (!%p291_p5)
}
 0x111   :  { %175 = dma.vmem_to_hbm [thread:$0]  %s173_s6, 128, %s359_s4, [#allocation5]  }
 0x112   :  { %307 = dma.done.wait [#allocation5], 128  }
 0x113   :  { %308 = vsyncadd [#allocation5], 4294967168 }
 0x114   :  { %179 = vsyncpa [#allocation4], 1 }
 0x115   :  { %180 = vsyncpa [#allocation7], 1 }
 0x116   :  { %181 = vsyncpa [#allocation5], 1 }

</bundles_post_ra>
